<compile_context>
chip_gen: v7x
topology: tpu7x:2x2x1
jax: 0.10.0
libtpu: 0.0.40
codegen_flags: <defaults>
</compile_context>

<pallas_src>
import functools

import jax
import jax.numpy as jnp
from jax.experimental import pallas as pl
from jax.experimental.pallas import tpu as pltpu

IN_FEATURES = 3
OUT_FEATURES = 8


def _linear_fused_kernel(x_ref, wb_ref, o_ref):
    # x_ref : (M, K) activations in SMEM -> scalar reads, broadcast via
    #         the sreg->vreg path (no XLU lane shuffles).
    # wb_ref: (K+1, N) fused [weight^T ; bias] block in VMEM (single DMA).
    # o_ref : (M, N) output in VMEM.
    k_dim = wb_ref.shape[0] - 1
    m_dim = o_ref.shape[0]
    for m in range(m_dim):                       # M == 1 here; fully unrolled
        acc = wb_ref[k_dim:k_dim + 1, :]         # bias row -> accumulator init
        for k in range(k_dim):                   # K == 3: unrolled VPU FMAs
            acc = acc + x_ref[m, k] * wb_ref[k:k + 1, :]
        o_ref[m:m + 1, :] = acc.astype(o_ref.dtype)


@jax.jit
def _linear_addmm(x, wb):
    """out = x @ W.T + b, with wb = concat([W.T, b[None, :]], axis=0)."""
    M = x.shape[0]
    N = wb.shape[1]
    return pl.pallas_call(
        _linear_fused_kernel,
        out_shape=jax.ShapeDtypeStruct((M, N), x.dtype),
        in_specs=[
            # x -> SMEM: consumed as scalars, no vector DMA / vreg residency.
            pl.BlockSpec(memory_space=pltpu.MemorySpace.SMEM),
            # fused weight^T + bias -> one whole-array VMEM operand.
            pl.BlockSpec(memory_space=pltpu.MemorySpace.VMEM),
        ],
        out_specs=pl.BlockSpec(memory_space=pltpu.MemorySpace.VMEM),
    )(x, wb)


class Model:
    """JAX/Pallas equivalent of the PyTorch module (Linear(3, 8))."""

    def __init__(self, key):
        in_features, out_features = IN_FEATURES, OUT_FEATURES
        k_w, k_b = jax.random.split(key)
        bound = 1.0 / (in_features ** 0.5)
        # Deterministic init mimicking nn.Linear's uniform(-1/sqrt(K), 1/sqrt(K)).
        self.weight = jax.random.uniform(
            k_w, (out_features, in_features), jnp.float32, -bound, bound
        )
        self.bias = jax.random.uniform(
            k_b, (out_features,), jnp.float32, -bound, bound
        )
        # Fused (K+1, N) operand built ONCE: rows 0..K-1 = W^T, row K = bias.
        self.wb = jnp.concatenate(
            [self.weight.T, self.bias.reshape(1, out_features)], axis=0
        )  # (4, 8)

    def forward(self, x):
        v1 = _linear_addmm(x, self.wb)
        outputs = [v1]
        return outputs


if __name__ == "__main__":
    key = jax.random.PRNGKey(0)
    k_model, k_input = jax.random.split(key)

    model = Model(k_model)
    x = jax.random.normal(k_input, (1, IN_FEATURES), dtype=jnp.float32)  # torch.randn(1, 3)

    outputs = model.forward(x)
    out = jax.block_until_ready(outputs[0])

    # Correctness check against plain-JAX reference (nn.Linear semantics).
    ref = x @ model.weight.T + model.bias
    assert out.shape == (1, OUT_FEATURES)
    assert jnp.allclose(out, ref, atol=1e-5), "mismatch vs reference"

    print("KERNEL_OK")
</pallas_src>

<mosaic_0001>
module attributes {stable_mosaic.version = 11 : i64} {
  func.func @_linear_fused_kernel(%arg0: memref<1x3xf32, #tpu.memory_space<smem>>, %arg1: memref<4x8xf32, #tpu.memory_space<vmem>>, %arg2: memref<1x8xf32, #tpu.memory_space<vmem>>) attributes {dimension_semantics = [], scalar_prefetch = 0 : i64, scratch_operands = 0 : i64, tpu.core_type = #tpu.core_type<tc>} {
    %c3 = arith.constant 3 : index
    %c0 = arith.constant 0 : index
    %0 = vector.load %arg1[%c3, %c0] : memref<4x8xf32, #tpu.memory_space<vmem>>, vector<1x8xf32>
    %c0_0 = arith.constant 0 : index
    %c0_1 = arith.constant 0 : index
    %1 = memref.load %arg0[%c0_0, %c0_1] : memref<1x3xf32, #tpu.memory_space<smem>>
    %c0_2 = arith.constant 0 : index
    %c0_3 = arith.constant 0 : index
    %2 = vector.load %arg1[%c0_2, %c0_3] : memref<4x8xf32, #tpu.memory_space<vmem>>, vector<1x8xf32>
    %3 = vector.broadcast %1 : f32 to vector<1x8xf32>
    %4 = arith.mulf %3, %2 : vector<1x8xf32>
    %5 = arith.addf %0, %4 : vector<1x8xf32>
    %c0_4 = arith.constant 0 : index
    %c1 = arith.constant 1 : index
    %6 = memref.load %arg0[%c0_4, %c1] : memref<1x3xf32, #tpu.memory_space<smem>>
    %c1_5 = arith.constant 1 : index
    %c0_6 = arith.constant 0 : index
    %7 = vector.load %arg1[%c1_5, %c0_6] : memref<4x8xf32, #tpu.memory_space<vmem>>, vector<1x8xf32>
    %8 = vector.broadcast %6 : f32 to vector<1x8xf32>
    %9 = arith.mulf %8, %7 : vector<1x8xf32>
    %10 = arith.addf %5, %9 : vector<1x8xf32>
    %c0_7 = arith.constant 0 : index
    %c2 = arith.constant 2 : index
    %11 = memref.load %arg0[%c0_7, %c2] : memref<1x3xf32, #tpu.memory_space<smem>>
    %c2_8 = arith.constant 2 : index
    %c0_9 = arith.constant 0 : index
    %12 = vector.load %arg1[%c2_8, %c0_9] : memref<4x8xf32, #tpu.memory_space<vmem>>, vector<1x8xf32>
    %13 = vector.broadcast %11 : f32 to vector<1x8xf32>
    %14 = arith.mulf %13, %12 : vector<1x8xf32>
    %15 = arith.addf %10, %14 : vector<1x8xf32>
    %c0_10 = arith.constant 0 : index
    %c0_11 = arith.constant 0 : index
    %16 = vector.load %arg2[%c0_10, %c0_11] : memref<1x8xf32, #tpu.memory_space<vmem>>, vector<1x8xf32>
    tpu.vector_store %arg2[%c0_10, %c0_11], %15 {strides = array<i32>} : memref<1x8xf32, #tpu.memory_space<vmem>>, vector<1x8xf32>,
    return
  }
}

</mosaic_0001>

<bundles_post_ra>
// kernel: _linear_addmm.1
= control target key start
LH: loop header
LB: loop body
LE: loop exit
PB: predicated region body
PF: predicated region fallthrough
CT: control target
= control target key end

     0   :  { %7 = vsyncpa [#allocation5], 0  ;;  %s188_s0 = inlined_call_operand.hbm [shape: f32[1,3], index: 0, kind: input, shape index: {}]   ;;  %s189_s1 = inlined_call_operand.hbm [shape: f32[4,8], index: 1, kind: input, shape index: {}]   ;;  %s190_s2 = inlined_call_operand.hbm [shape: f32[1,8], index: 2, kind: output, shape index: {}]  }
   0x1   :  { %8 = vsyncpa [#allocation3], 0 }
   0x2   :  { %9 = vsyncpa [#allocation4], 0  ;;  %s74_s11 = scalar_lea.hbm %s188_s0, 16 }
   0x3   :  { %p75_p0 = scmp.ne.s32.totalorder %s188_s0, %s74_s11  ;;  %p78_p1 = scmp.lt.u32.totalorder %s74_s11, %s188_s0 }
   0x5   :  { %p80_p2 = pnand %p78_p1, %p75_p0 }
   0x7   :  { %83 = shalt.err (!%p80_p2)
}
   0x8   :  { %s134_s16 = smov [#allocation2]   ;;  %s135_s19 = smov [#allocation6]  }
   0x9   :  { %17 = dma.hbm_to_smem %s188_s0, 16, %s134_s16, [#allocation5]  }
   0xa   :  { %s24_s20 = sshll.u32 %s135_s19, 4  ;;  %s84_s23 = scalar_lea.hbm %s189_s1, 64  ;;  %s25_s20 = int_to_ptr.vmem [resolvable:$true] %s24_s20 }
   0xb   :  { %p85_p3 = scmp.ne.s32.totalorder %s189_s1, %s84_s23  ;;  %p88_p4 = scmp.lt.u32.totalorder %s84_s23, %s189_s1 }
   0xd   :  { %p90_p5 = pnand %p88_p4, %p85_p3 }
   0xf   :  { %93 = shalt.err (!%p90_p5)
}
  0x10   :  { %s94_s28 = scalar_lea.vmem %s25_s20, 64  ;;  %p99_p7 = scmp.lt.s32.totalorder %s25_s20, %s25_s20 }
  0x11   :  { %p95_p6 = scmp.ne.s32.totalorder %s25_s20, %s94_s28  ;;  %p100_p8 = scmp.lt.s32.totalorder %s94_s28, %s94_s28 }
  0x13   :  { %p101_p9 = por %p100_p8, %p99_p7 }
  0x15   :  { %p102_p10 = pnand %p101_p9, %p95_p6 }
  0x17   :  { %105 = shalt.err (!%p102_p10)
}
  0x18   :  { %27 = dma.hbm_to_vmem [thread:$0]  %s189_s1, 64, %s25_s20, [#allocation3]  }
  0x19   :  { %128 = dma.done.wait [#allocation5], 16  }
  0x1a   :  { %129 = vsyncadd [#allocation5], 4294967280 }
  0x1b   :  { %130 = dma.done.wait [#allocation3], 64  }
  0x1c   :  { %131 = vsyncadd [#allocation3], 4294967232 }
  0x1d   :  { %34 = sfence }
  0x1e   :  { %s36_s30 = sld [smem:[#allocation2]]  ;;  %s69_s3 = sld [smem:[#allocation2 + $0x1]]  ;;  %v37_v0 = vld [vmem:[#allocation6] sm:$0x1]  ;;  %v42_v1 = vld [vmem:[#allocation6 + $0x1] sm:$0x1] }
  0x1f   :  { %s70_s4 = sld [smem:[#allocation2 + $0x2]]  ;;  %v35_v2 = vld [vmem:[#allocation6 + $0x3] sm:$0x1]  ;;  %v47_v4 = vld [vmem:[#allocation6 + $0x2] sm:$0x1]  ;;  %s136_s1 = smov [#allocation7]  }
  0x20   :  { %s59_s5 = sshll.u32 %s136_s1, 4  ;;  %vm51_vm0 = vcmask 57344   ;;  %s60_s5 = int_to_ptr.vmem [resolvable:$true] %s59_s5 }
  0x21   :  { %s106_s6 = scalar_lea.vmem %s60_s5, 16  ;;  %s110_s7 = scalar_lea.vmem %s60_s5, 32 }
  0x22   :  { %p107_p11 = scmp.ne.s32.totalorder %s60_s5, %s106_s6  ;;  %p111_p12 = scmp.lt.s32.totalorder %s60_s5, %s60_s5 }
  0x23   :  { %p112_p13 = scmp.lt.s32.totalorder %s110_s7, %s106_s6 }
  0x24   :  { %v38_v3 = vstv %s36_s30  ;;  %v43_v6 = vstv %s69_s3 }
  0x25   :  { %v39_v5 = vmul.f32 %v38_v3, %v37_v0  ;;  %v48_v7 = vstv %s70_s4  ;;  %v44_v8 = vmul.f32 %v43_v6, %v42_v1  ;;  %p113_p0 = por %p112_p13, %p111_p12 }
  0x26   :  { %v49_v10 = vmul.f32 %v48_v7, %v47_v4 }
  0x27   :  { %v40_v9 = vadd.f32 %v39_v5, %v35_v2  ;;  %p114_p1 = pnand %p113_p0, %p107_p11 }
  0x29   :  { %v45_v11 = vadd.f32 %v44_v8, %v40_v9 }
  0x2b   :  { %v50_v12 = vadd.f32 %v49_v10, %v45_v11 }
  0x2d   :  { %52 = vst.msk [vmem:[#allocation7] sm:$0x1] %vm51_vm0, %v50_v12 }
  0x2e   :  { %117 = shalt.err (!%p114_p1)
}
  0x2f   :  { %s118_s10 = scalar_lea.hbm %s190_s2, 16 }
  0x30   :  { %p119_p2 = scmp.ne.s32.totalorder %s190_s2, %s118_s10  ;;  %p122_p3 = scmp.lt.u32.totalorder %s118_s10, %s190_s2 }
  0x32   :  { %p124_p4 = pnand %p122_p3, %p119_p2 }
  0x34   :  { %127 = shalt.err (!%p124_p4)
}
  0x35   :  { %62 = dma.vmem_to_hbm [thread:$0]  %s60_s5, 16, %s190_s2, [#allocation4]  }
  0x36   :  { %132 = dma.done.wait [#allocation4], 16  }
  0x37   :  { %133 = vsyncadd [#allocation4], 4294967280 }
  0x38   :  { %66 = vsyncpa [#allocation3], 1 }
  0x39   :  { %67 = vsyncpa [#allocation4], 1 }
  0x3a   :  { %68 = vsyncpa [#allocation5], 1 }

</bundles_post_ra>
